<compile_context>
chip_gen: v7x
topology: tpu7x:2x2x1
jax: 0.10.0
libtpu: 0.0.40
codegen_flags: <defaults>
</compile_context>

<pallas_src>
import math

import jax
import jax.numpy as jnp
from jax import lax
from jax.experimental import pallas as pl
from jax.experimental.pallas import tpu as pltpu

_IN = 784           # 1*28*28
_H = 32             # hidden width (layers 1 and 2)
_OUT = 10           # real logits
_OUT_PAD = 64       # logits padded so the packed output is exactly 128 lanes
_PACK = _H + _H + _OUT_PAD          # 128 = lane-dense output width

# x:(B,K) . w:(N,K) -> (B,N) without materializing w.T (MXU transposed-RHS path)
_CONTRACT_LAST = (((1,), (1,)), ((), ()))


def _dual_classifier_kernel(x_ref, w1_ref, w2_ref, w3_ref, out_ref):
    """One batch tile of the 3-layer bias-free MLP (ReLU after layers 1, 2).

    out_ref is one lane-dense (TB, 128) buffer packed along lanes as:
      [  0: 32)  x1     = x  @ w1.T   (pre-ReLU, layer 1)
      [ 32: 64)  x3     = r1 @ w2.T   (pre-ReLU, layer 2)
      [ 64:128)  logits = r2 @ w3p.T  (10 real columns + 54 zero columns)
    Post-ReLU activations are recomputed in the wrapper (cheaper than storing).
    """
    x = x_ref[...]                                                # (TB, 784) bf16

    # layer 1: bf16 x bf16 -> f32 accumulate on the MXU
    x1 = lax.dot_general(x, w1_ref[...], dimension_numbers=_CONTRACT_LAST,
                         preferred_element_type=jnp.float32)      # (TB, 32)
    r1 = jnp.maximum(x1, 0.0)

    # layer 2
    x3 = lax.dot_general(r1, w2_ref[...], dimension_numbers=_CONTRACT_LAST,
                         preferred_element_type=jnp.float32)      # (TB, 32)
    r2 = jnp.maximum(x3, 0.0)

    # layer 3 (w3 zero-padded to 64 output rows -> lane-dense logits block)
    logits = lax.dot_general(r2, w3_ref[...], dimension_numbers=_CONTRACT_LAST,
                             preferred_element_type=jnp.float32)  # (TB, 64)

    out_ref[:, 0:_H] = x1
    out_ref[:, _H:2 * _H] = x3
    out_ref[:, 2 * _H:_PACK] = logits


def _round_up(n, m):
    return (n + m - 1) // m * m


def dual_classifier_forward(x_img, w1, w2, w3, *, tile_b=1024):
    """Pallas forward of DualClassifier.

    Returns (logits, inputs) mirroring the PyTorch module:
      inputs = [(x_flat, None), (relu(x1), x1), (relu(x3), x3)]
    """
    B = x_img.shape[0]
    x_flat = x_img.reshape(B, -1).astype(jnp.float32)     # flatten(1, -1)
    assert x_flat.shape[1] == _IN

    # Batch tiling: rows per tile must be a multiple of 8 (f32 sublanes);
    # TB <= 1024 keeps tiles a few MiB -> safe within v7x's 64 MiB VMEM.
    TB = min(tile_b, _round_up(B, 8))
    B_pad = _round_up(B, TB)

    # Dominant HBM stream in bf16 (halves x traffic; f32 accumulate in kernel).
    x_in = x_flat.astype(jnp.bfloat16)
    if B_pad != B:
        x_in = jnp.pad(x_in, ((0, B_pad - B), (0, 0)))
    w1_in = w1.astype(jnp.bfloat16)
    w2_in = w2.astype(jnp.float32)
    w3_in = jnp.pad(w3.astype(jnp.float32), ((0, _OUT_PAD - _OUT), (0, 0)))  # (64, 32)

    grid = (B_pad // TB,)
    flops = 2 * B_pad * (_IN * _H + _H * _H + _H * _OUT_PAD)
    bytes_accessed = (x_in.size * 2 + w1_in.size * 2 + w2_in.size * 4
                      + w3_in.size * 4 + B_pad * _PACK * 4)

    packed = pl.pallas_call(
        _dual_classifier_kernel,
        out_shape=jax.ShapeDtypeStruct((B_pad, _PACK), jnp.float32),
        grid=grid,
        in_specs=[
            pl.BlockSpec((TB, _IN), lambda i: (i, 0)),        # x: batch-tiled
            pl.BlockSpec((_H, _IN), lambda i: (0, 0)),        # w1: VMEM-resident
            pl.BlockSpec((_H, _H), lambda i: (0, 0)),         # w2: VMEM-resident
            pl.BlockSpec((_OUT_PAD, _H), lambda i: (0, 0)),   # w3 (padded)
        ],
        out_specs=pl.BlockSpec((TB, _PACK), lambda i: (i, 0)),
        compiler_params=pltpu.CompilerParams(
            dimension_semantics=("parallel",),
        ),
        cost_estimate=pl.CostEstimate(flops=flops, transcendentals=0,
                                      bytes_accessed=bytes_accessed),
    )(x_in, w1_in, w2_in, w3_in)

    packed = packed[:B]
    x1 = packed[:, 0:_H]
    x3 = packed[:, _H:2 * _H]
    logits = packed[:, 2 * _H:2 * _H + _OUT]
    r1 = jnp.maximum(x1, 0.0)
    r2 = jnp.maximum(x3, 0.0)

    inputs = [(x_flat, None), (r1, x1), (r2, x3)]
    return logits, inputs


def _kaiming_uniform(key, shape, a=math.sqrt(5)):
    """Matches torch.nn.init.kaiming_uniform_(w, a=sqrt(5)):
    bound = sqrt(6 / ((1 + a^2) * fan_in)) = sqrt(1 / fan_in)."""
    fan_in = shape[1]
    gain = math.sqrt(2.0 / (1.0 + a * a))
    bound = gain * math.sqrt(3.0 / fan_in)
    return jax.random.uniform(key, shape, jnp.float32, -bound, bound)


def _reference_forward(x_img, w1, w2, w3):
    x = x_img.reshape(x_img.shape[0], -1).astype(jnp.float32)
    x1 = x @ w1.T
    r1 = jnp.maximum(x1, 0.0)
    x3 = r1 @ w2.T
    r2 = jnp.maximum(x3, 0.0)
    return r2 @ w3.T, x1, x3


if __name__ == "__main__":
    key = jax.random.PRNGKey(0)
    k_x, k_w1, k_w2, k_w3, k_f1, k_f2, k_f3 = jax.random.split(key, 7)

    B = 2
    x_img = jax.random.normal(k_x, (B, 1, 28, 28), jnp.float32)

    # DualLinear forward weights (out_features, in_features).
    w1 = _kaiming_uniform(k_w1, (32, 784))
    w2 = _kaiming_uniform(k_w2, (32, 32))
    w3 = _kaiming_uniform(k_w3, (10, 32))

    # ReversedSiameseNet feedback weights: only used by the custom backward
    # (feedback alignment); built for API parity, forward no-ops.
    fb = [_kaiming_uniform(k_f1, (32, 784)),
          _kaiming_uniform(k_f2, (32, 32)),
          _kaiming_uniform(k_f3, (10, 32))]
    del fb

    logits, inputs = dual_classifier_forward(x_img, w1, w2, w3)
    logits = jax.block_until_ready(logits)
    jax.block_until_ready(inputs)

    ref_logits, ref_x1, ref_x3 = _reference_forward(x_img, w1, w2, w3)
    assert logits.shape == (B, 10)
    # bf16 layer-1 input stream -> slightly looser tolerance vs f32 reference.
    assert jnp.allclose(logits, ref_logits, atol=1e-2, rtol=1e-2)
    assert jnp.allclose(inputs[1][1], ref_x1, atol=1e-2, rtol=1e-2)
    assert jnp.allclose(inputs[2][1], ref_x3, atol=1e-2, rtol=1e-2)
    assert inputs[0][1] is None
    assert jnp.array_equal(inputs[1][0], jnp.maximum(inputs[1][1], 0.0))
    assert jnp.array_equal(inputs[2][0], jnp.maximum(inputs[2][1], 0.0))

    print("KERNEL_OK")
</pallas_src>

<mosaic_0001>
module attributes {stable_mosaic.version = 11 : i64} {
  func.func @_dual_classifier_kernel(%arg0: i32, %arg1: memref<8x784xbf16, #tpu.memory_space<vmem>>, %arg2: memref<32x784xbf16, #tpu.memory_space<vmem>>, %arg3: memref<32x32xf32, #tpu.memory_space<vmem>>, %arg4: memref<64x32xf32, #tpu.memory_space<vmem>>, %arg5: memref<8x128xf32, #tpu.memory_space<vmem>>) attributes {dimension_semantics = [#tpu.dimension_semantics<parallel>], iteration_bounds = array<i64: 1>, scalar_prefetch = 0 : i64, scratch_operands = 0 : i64, tpu.core_type = #tpu.core_type<tc>, window_params = [{transform_indices = @transform_0, window_bounds = array<i64: 8, 784>}, {pipeline_mode = #tpu.pipeline_mode<synchronous>, transform_indices = @transform_1, window_bounds = array<i64: 32, 784>}, {pipeline_mode = #tpu.pipeline_mode<synchronous>, transform_indices = @transform_2, window_bounds = array<i64: 32, 32>}, {pipeline_mode = #tpu.pipeline_mode<synchronous>, transform_indices = @transform_3, window_bounds = array<i64: 64, 32>}, {transform_indices = @transform_4, window_bounds = array<i64: 8, 128>}]} {
    %c0 = arith.constant 0 : index
    %c0_0 = arith.constant 0 : index
    %0 = vector.load %arg1[%c0, %c0_0] : memref<8x784xbf16, #tpu.memory_space<vmem>>, vector<8x784xbf16>
    %c0_1 = arith.constant 0 : index
    %c0_2 = arith.constant 0 : index
    %1 = vector.load %arg2[%c0_1, %c0_2] : memref<32x784xbf16, #tpu.memory_space<vmem>>, vector<32x784xbf16>
    %cst = arith.constant dense<0.000000e+00> : vector<8x32xf32>
    %2 = tpu.matmul %0, %1, %cst {dimension_numbers = #tpu.dot_dimension_numbers<[1], [1], [0], [0], [0, 0, 1, 0], [], []>} : vector<8x784xbf16>, vector<32x784xbf16>, vector<8x32xf32> -> vector<8x32xf32>
    %cst_3 = arith.constant 0.000000e+00 : f32
    %3 = vector.broadcast %cst_3 : f32 to vector<8x32xf32>
    %4 = arith.maximumf %2, %3 : vector<8x32xf32>
    %c0_4 = arith.constant 0 : index
    %c0_5 = arith.constant 0 : index
    %5 = vector.load %arg3[%c0_4, %c0_5] : memref<32x32xf32, #tpu.memory_space<vmem>>, vector<32x32xf32>
    %cst_6 = arith.constant dense<0.000000e+00> : vector<8x32xf32>
    %6 = tpu.matmul %4, %5, %cst_6 {dimension_numbers = #tpu.dot_dimension_numbers<[1], [1], [0], [0], [0, 0, 1, 0], [], []>} : vector<8x32xf32>, vector<32x32xf32>, vector<8x32xf32> -> vector<8x32xf32>
    %cst_7 = arith.constant 0.000000e+00 : f32
    %7 = vector.broadcast %cst_7 : f32 to vector<8x32xf32>
    %8 = arith.maximumf %6, %7 : vector<8x32xf32>
    %c0_8 = arith.constant 0 : index
    %c0_9 = arith.constant 0 : index
    %9 = vector.load %arg4[%c0_8, %c0_9] : memref<64x32xf32, #tpu.memory_space<vmem>>, vector<64x32xf32>
    %cst_10 = arith.constant dense<0.000000e+00> : vector<8x64xf32>
    %10 = tpu.matmul %8, %9, %cst_10 {dimension_numbers = #tpu.dot_dimension_numbers<[1], [1], [0], [0], [0, 0, 1, 0], [], []>} : vector<8x32xf32>, vector<64x32xf32>, vector<8x64xf32> -> vector<8x64xf32>
    %c0_11 = arith.constant 0 : index
    %c0_12 = arith.constant 0 : index
    %11 = vector.load %arg5[%c0_11, %c0_12] : memref<8x128xf32, #tpu.memory_space<vmem>>, vector<8x32xf32>
    tpu.vector_store %arg5[%c0_11, %c0_12], %2 {strides = array<i32>} : memref<8x128xf32, #tpu.memory_space<vmem>>, vector<8x32xf32>,
    %c0_13 = arith.constant 0 : index
    %c32 = arith.constant 32 : index
    %12 = vector.load %arg5[%c0_13, %c32] : memref<8x128xf32, #tpu.memory_space<vmem>>, vector<8x32xf32>
    tpu.vector_store %arg5[%c0_13, %c32], %6 {strides = array<i32>} : memref<8x128xf32, #tpu.memory_space<vmem>>, vector<8x32xf32>,
    %c0_14 = arith.constant 0 : index
    %c64 = arith.constant 64 : index
    %13 = vector.load %arg5[%c0_14, %c64] : memref<8x128xf32, #tpu.memory_space<vmem>>, vector<8x64xf32>
    tpu.vector_store %arg5[%c0_14, %c64], %10 {strides = array<i32>} : memref<8x128xf32, #tpu.memory_space<vmem>>, vector<8x64xf32>,
    return
  }
  func.func @transform_0(%arg0: i32) -> (i32, i32) {
    %c0_i32 = arith.constant 0 : i32
    %c0_i32_0 = arith.constant 0 : i32
    return %arg0, %c0_i32 : i32, i32
  }
  func.func @transform_1(%arg0: i32) -> (i32, i32) {
    %c0_i32 = arith.constant 0 : i32
    %c0_i32_0 = arith.constant 0 : i32
    %c0_i32_1 = arith.constant 0 : i32
    return %c0_i32, %c0_i32_0 : i32, i32
  }
  func.func @transform_2(%arg0: i32) -> (i32, i32) {
    %c0_i32 = arith.constant 0 : i32
    %c0_i32_0 = arith.constant 0 : i32
    %c0_i32_1 = arith.constant 0 : i32
    return %c0_i32, %c0_i32_0 : i32, i32
  }
  func.func @transform_3(%arg0: i32) -> (i32, i32) {
    %c0_i32 = arith.constant 0 : i32
    %c0_i32_0 = arith.constant 0 : i32
    %c0_i32_1 = arith.constant 0 : i32
    return %c0_i32, %c0_i32_0 : i32, i32
  }
  func.func @transform_4(%arg0: i32) -> (i32, i32) {
    %c0_i32 = arith.constant 0 : i32
    %c0_i32_0 = arith.constant 0 : i32
    return %arg0, %c0_i32 : i32, i32
  }
}

</mosaic_0001>

<bundles_post_ra>
// kernel: tpu_custom_call.1
= control target key start
LH: loop header
LB: loop body
LE: loop exit
PB: predicated region body
PF: predicated region fallthrough
CT: control target
= control target key end

     0   :  { %9 = vsyncpa [#allocation3], 0  ;;  %s886_s0 = inlined_call_operand.vmem [shape: bf16[8,784], index: 0, kind: input, shape index: {}]   ;;  %s887_s1 = inlined_call_operand.hbm [shape: bf16[32,784], index: 1, kind: input, shape index: {}]   ;;  %s888_s2 = inlined_call_operand.vmem [shape: f32[32,32], index: 2, kind: input, shape index: {}]   ;;  %s889_s3 = inlined_call_operand.vmem [shape: f32[64,32], index: 3, kind: input, shape index: {}]   ;;  %s890_s4 = inlined_call_operand.hbm [shape: f32[8,128], index: 4, kind: output, shape index: {}]  }
   0x1   :  { %10 = vsyncpa [#allocation4], 0  ;;  %s750_s15 = smov [#allocation2]   ;;  %s702_s19 = scalar_lea.hbm %s887_s1, 1792 }
   0x2   :  { %s18_s16 = sshll.u32 %s750_s15, 4  ;;  %p703_p0 = scmp.ne.s32.totalorder %s887_s1, %s702_s19  ;;  %s19_s16 = int_to_ptr.vmem [resolvable:$true] %s18_s16 }
   0x3   :  { %p706_p1 = scmp.lt.u32.totalorder %s702_s19, %s887_s1 }
   0x5   :  { %p708_p2 = pnand %p706_p1, %p703_p0 }
   0x7   :  { %711 = shalt.err (!%p708_p2)
}
   0x8   :  { %s712_s24 = scalar_lea.vmem %s19_s16, 1792  ;;  %p717_p4 = scmp.lt.s32.totalorder %s19_s16, %s19_s16 }
   0x9   :  { %p713_p3 = scmp.ne.s32.totalorder %s19_s16, %s712_s24  ;;  %p718_p5 = scmp.lt.s32.totalorder %s712_s24, %s712_s24 }
   0xb   :  { %p719_p6 = por %p718_p5, %p717_p4 }
   0xd   :  { %p720_p7 = pnand %p719_p6, %p713_p3 }
   0xf   :  { %723 = shalt.err (!%p720_p7)
}
  0x10   :  { %s751_s25 = smov 448   ;;  %s752_s26 = smov 28  }
  0x11   :  { %24 = dma.hbm_to_vmem [thread:$0]  %s887_s1, 1792, %s19_s16, [#allocation3], %s751_s25, %s751_s25, %s752_s26  }
  0x12   :  { %746 = dma.done.wait [#allocation3], 1792  }
  0x13   :  { %747 = vsyncadd [#allocation3], 4294965504  ;;  %v675_v0 = vld [vmem:[#allocation2 + $0xc] ss:$28 sps:$4 sm:$0xff]   ;;  %v678_v2 = vld [vmem:[#allocation2 + $0x44] ss:$28 sps:$4 sm:$0xff]  }
  0x14   :  { %v677_v1 = vld [vmem:[#allocation2 + $0x8] ss:$28 sps:$4 sm:$0xff]   ;;  %197 = vmatprep.subr.bf16.mxu0 %v675_v0  ;;  %v691_v6 = vld [vmem:[#allocation2] ss:$28 sps:$4 sm:$0xff]   ;;  %v685_v8 = vld [vmem:[#allocation2 + $0x14] ss:$28 sps:$4 sm:$0xff]  }
  0x15   :  { %v34_v3 = vld [vmem:[%s886_s0 + $0x8] sm:$0xff]  ;;  %198 = vmatpush1.bf16.xpose.msra.mxu0 %v677_v1  ;;  %v689_v5 = vld [vmem:[#allocation2 + $0x4] ss:$28 sps:$4 sm:$0xff]   ;;  %v695_v9 = vld [vmem:[#allocation2 + $0x3c] ss:$28 sps:$4 sm:$0xff]   ;;  %v753_v18 = vmov 0.0|0.0  }
  0x16   :  { %v545_v4 = vcombine.high %v34_v3, %v34_v3  ;;  %199 = vmatprep.subr.bf16.mxu0 %v678_v2  ;;  %v680_v7 = vld [vmem:[#allocation2 + $0x40] ss:$28 sps:$4 sm:$0xff]   ;;  %157 = vmatprep.subr.bf16.mxu1 %v689_v5  ;;  %v35_v12 = vld [vmem:[%s886_s0 + $0x10] sm:$0xff]  ;;  %v544_v14 = vcombine.low %v34_v3, %v34_v3  ;;  %v688_v17 = vld [vmem:[#allocation2 + $0x4c] ss:$28 sps:$4 sm:$0xff]   ;;  %vm322_vm0 = vcmask 261120  }
  0x17   :  { %158 = vmatpush1.bf16.xpose.msra.mxu1 %v691_v6  ;;  %v33_v10 = vld [vmem:[%s886_s0] sm:$0xff]  ;;  %v697_v13 = vld [vmem:[#allocation2 + $0x38] ss:$28 sps:$4 sm:$0xff]   ;;  %v683_v15 = vld [vmem:[#allocation2 + $0x10] ss:$28 sps:$4 sm:$0xff]   ;;  %v547_v16 = vcombine.high %v35_v12, %v35_v12  ;;  %vm754_vm2 = vmmov 0   ;;  %v546_v27 = vcombine.low %v35_v12, %v35_v12 }
  0x18   :  { %229 = vmatprep.mubr.bf16.mxu0 %v545_v4  ;;  %159 = vmatprep.subr.bf16.mxu1 %v695_v9  ;;  %v543_v11 = vcombine.high %v33_v10, %v33_v10  ;;  %v318_v19 = vld [vmem:[%s888_s2] sm:$0xff]  ;;  %v319_v20 = vld [vmem:[%s888_s2 + $0x8] sm:$0xff]  ;;  %v542_v21 = vcombine.low %v33_v10, %v33_v10  ;;  %vm814_vm1 = vmpackc.low %vm322_vm0, %vm322_vm0  ;;  %v755_v25 = vmov 0.0   ;;  %vm147_vm3 = vcmask 130048   ;;  %s756_s5 = smov 32   ;;  %s757_s6 = smov 64  }
  0x19   :  { %v634_v22 = vpack.c.bf16 %v319_v20, %v318_v19  ;;  %v686_v24 = vld [vmem:[#allocation2 + $0x48] ss:$28 sps:$4 sm:$0xff]   ;;  %v694_v26 = vld [vmem:[#allocation2 + $0x18] ss:$28 sps:$4 sm:$0xff]   ;;  %v698_v29 = vld [vmem:[#allocation2 + $0x50] ss:$28 sps:$4 sm:$0xff]  }
  0x1a   :  { %189 = vmatprep.mubr.bf16.mxu1 %v543_v11  ;;  %v152_v28 = vsel %vm147_vm3, %v694_v26, 0  ;;  %v155_v30 = vsel %vm147_vm3, %v698_v29, 0  ;;  %v701_v31 = vld [vmem:[%s886_s0 + $0x18] ss:$0 sps:$4 sm:$0xff]   ;;  %v320_v32 = vld [vmem:[%s888_s2 + $0x10] sm:$0xff]  ;;  %v409_v39 = vld [vmem:[%s889_s3] sm:$0xff] }
  0x1b   :  { %v321_v33 = vld [vmem:[%s888_s2 + $0x18] sm:$0xff]  ;;  %v410_v40 = vld [vmem:[%s889_s3 + $0x8] sm:$0xff]  ;;  %v411_v48 = vld [vmem:[%s889_s3 + $0x10] sm:$0xff]  ;;  %vm519_vm4 = vcmask 523520   ;;  %s758_s7 = smov [#allocation5]   ;;  %vm525_vm5 = vcmask 1048064  }
  0x1c   :  { %v638_v34 = vpack.c.bf16 %v321_v33, %v320_v32  ;;  %v642_v45 = vpack.c.bf16 %v410_v40, %v409_v39  ;;  %v412_v49 = vld [vmem:[%s889_s3 + $0x18] sm:$0xff]  ;;  %v413_v51 = vld [vmem:[%s889_s3 + $0x20] sm:$0xff]  ;;  %v414_v52 = vld [vmem:[%s889_s3 + $0x28] sm:$0xff] }
  0x1d   :  { %200 = vmatpush1.bf16.xpose.msra.mxu0 %v680_v7  ;;  %v646_v50 = vpack.c.bf16 %v412_v49, %v411_v48  ;;  %v650_v53 = vpack.c.bf16 %v414_v52, %v413_v51  ;;  %v415_v54 = vld [vmem:[%s889_s3 + $0x30] sm:$0xff]  ;;  %v416_v55 = vld [vmem:[%s889_s3 + $0x38] sm:$0xff]  ;;  %s533_s3 = sshll.u32 %s758_s7, 4  ;;  %s534_s3 = int_to_ptr.vmem [resolvable:$true] %s533_s3 }
  0x1e   :  { %237 = vmatprep.subr.bf16.mxu0 %v685_v8  ;;  %v654_v56 = vpack.c.bf16 %v416_v55, %v415_v54  ;;  %s724_s8 = scalar_lea.vmem %s534_s3, 128  ;;  %p729_p9 = scmp.lt.s32.totalorder %s534_s3, %s534_s3 }
  0x1f   :  { %160 = vmatpush1.bf16.xpose.msra.mxu1 %v697_v13  ;;  %p725_p8 = scmp.ne.s32.totalorder %s534_s3, %s724_s8  ;;  %p730_p10 = scmp.lt.s32.totalorder %s724_s8, %s724_s8 }
  0x20   :  { %633 = vmatprep.subr.bf16.mxu1 %v753_v18 }
  0x21   :  { %p731_p11 = por %p730_p10, %p729_p9 }
  0x23   :  { %p732_p12 = pnand %p731_p11, %p725_p8 }
  0x24   :  { %230 = vmatmul.mubr.bf16.vlgmr.msra.gmra.mrb[0].mxu0 %v544_v14 }
  0x25   :  { %238 = vmatpush1.bf16.xpose.msra.mxu0 %v683_v15  ;;  %269 = vmatprep.mubr.bf16.mxu0 %v547_v16 }
  0x26   :  { %239 = vmatprep.subr.bf16.mxu0 %v688_v17  ;;  %190 = vmatmul.mubr.bf16.vlgmr.msra.gmra.mrb[0].mxu1 %v542_v21 }
  0x27   :  { %636 = vmatpush3.bf16.xpose.msk.msra.mxu1 %vm814_vm1, %v634_v22  ;;  %611 = vmatprep.mubr.msk.f32.mxu1 %vm754_vm2, %v755_v25 }
  0x28   :  { %637 = vmatprep.subr.bf16.mxu1 %v753_v18 }
  0x2d   :  { %240 = vmatpush1.bf16.xpose.msra.mxu0 %v686_v24 }
  0x2e   :  { %595 = vmatprep.subr.bf16.mxu0 %v755_v25 }
  0x2f   :  { %640 = vmatpush3.bf16.xpose.msk.msra.mxu1 %vm814_vm1, %v638_v34 }
  0x30   :  { %641 = vmatprep.subr.bf16.mxu1 %v753_v18 }
  0x34   :  { %270 = vmatmul.mubr.bf16.vlgmr.msra.gmra.mrb[0].mxu0 %v546_v27 }
  0x35   :  { %596 = vmatpush3.bf16.xpose.msra.mxu0 %v152_v28  ;;  %599 = vmatprep.mubr.msk.bf16.mxu0 %vm754_vm2, %v755_v25 }
  0x36   :  { %597 = vmatprep.subr.bf16.mxu0 %v755_v25 }
  0x3d   :  { %598 = vmatpush3.bf16.xpose.msra.mxu0 %v155_v30 }
  0x44   :  { %600 = vmatmul.mubr.msk.bf16.vlgmr.msra.gmra.mrb[0].mxu0 %vm147_vm3, %v701_v31 }
  0xf9   :  { %v191_v35 = vpop.f32.mrb[0].mxu1 }
  0xfa   :  { %v193_v36 = vpop.f32.mrb[1].mxu1 }
  0xfb   :  { %v194_v37 = vpop.f32.mrb[2].mxu1 }
  0xfc   :  { %v195_v38 = vpop.f32.mrb[3].mxu1 }
 0x117   :  { %v311_v41 = vpop.f32.mrb[0].mxu0 }
 0x118   :  { %v657_v42 = vadd.f32 %v311_v41, %v191_v35  ;;  %v601_v43 = vpop.f32.mrb[1].mxu0 }
 0x119   :  { %v314_v44 = vpop.f32.mrb[2].mxu0 }
 0x11a   :  { %v317_v46 = vmax.f32 %v657_v42, 0.0  ;;  %514 = vst.msk [vmem:[#allocation5] sm:$0xff] %vm322_vm0, %v657_v42  ;;  %v602_v47 = vpop.f32.mrb[3].mxu0 }
 0x11c   :  { %612 = vmatmul.mubr.msk.f32.vlgmr.msra.gmra.mrb[4].mxu1 %vm322_vm0, %v317_v46 }
 0x11d   :  { %644 = vmatpush3.bf16.xpose.msk.msra.mxu1 %vm814_vm1, %v642_v45  ;;  %630 = vmatprep.mubr.msk.f32.mxu1 %vm754_vm2, %v755_v25 }
 0x11e   :  { %645 = vmatprep.subr.bf16.mxu1 %v753_v18 }
 0x125   :  { %648 = vmatpush3.bf16.xpose.msk.msra.mxu1 %vm814_vm1, %v646_v50 }
 0x126   :  { %649 = vmatprep.subr.bf16.mxu1 %v753_v18 }
 0x12d   :  { %652 = vmatpush3.bf16.xpose.msk.msra.mxu1 %vm814_vm1, %v650_v53 }
 0x12e   :  { %653 = vmatprep.subr.bf16.mxu1 %v753_v18 }
 0x135   :  { %656 = vmatpush3.bf16.xpose.msk.msra.mxu1 %vm814_vm1, %v654_v56 }
 0x1ef   :  { %v404_v57 = vpop.f32.mrb[4].mxu1 }
 0x1f0   :  { %v408_v58 = vmax.f32 %v404_v57, 0.0  ;;  %516 = vrot.lane.b32.xlu0 %v404_v57, %s756_s5  ;;  %v613_v59 = vpop.f32.mrb[5].mxu1 }
 0x1f2   :  { %631 = vmatmul.mubr.msk.f32.vlgmr.msra.gmra.mrb[6].mxu1 %vm322_vm0, %v408_v58 }
 0x262   :  { %v517_v60 = vpop.permute.xlu0 %516 }
 0x263   :  { %520 = vst.msk [vmem:[#allocation5] sm:$0xff] %vm519_vm4, %v517_v60 }
 0x2c5   :  { %v510_v61 = vpop.f32.mrb[6].mxu1 }
 0x2c6   :  { %522 = vrot.lane.b32.xlu0 %v510_v61, %s757_s6  ;;  %v632_v62 = vpop.f32.mrb[7].mxu1 }
 0x338   :  { %v523_v63 = vpop.permute.xlu0 %522 }
 0x339   :  { %526 = vst.msk [vmem:[#allocation5] sm:$0xff] %vm525_vm5, %v523_v63 }
 0x33a   :  { %735 = shalt.err (!%p732_p12)
}
 0x33b   :  { %s736_s11 = scalar_lea.hbm %s890_s4, 128 }
 0x33c   :  { %p737_p13 = scmp.ne.s32.totalorder %s890_s4, %s736_s11  ;;  %p740_p0 = scmp.lt.u32.totalorder %s736_s11, %s890_s4 }
 0x33e   :  { %p742_p1 = pnand %p740_p0, %p737_p13 }
 0x340   :  { %745 = shalt.err (!%p742_p1)
}
 0x341   :  { %536 = dma.vmem_to_hbm [thread:$0]  %s534_s3, 128, %s890_s4, [#allocation4]  }
 0x342   :  { %748 = dma.done.wait [#allocation4], 128  }
 0x343   :  { %749 = vsyncadd [#allocation4], 4294967168 }
 0x344   :  { %540 = vsyncpa [#allocation3], 1 }
 0x345   :  { %541 = vsyncpa [#allocation4], 1 }

</bundles_post_ra>
